<compile_context>
chip_gen: v6e
topology: v6e:2x2x1
jax: 0.10.0
libtpu: 0.0.40
codegen_flags: <defaults>
</compile_context>

<pallas_src>
import functools

import jax
import jax.numpy as jnp
from jax import lax
from jax.experimental import pallas as pl
from jax.experimental.pallas import tpu as pltpu


# ----------------------------------------------------------------------------
# Small helpers
# ----------------------------------------------------------------------------
def _round_up(x, m):
    return ((x + m - 1) // m) * m


def _tpu_vmem_capacity_bytes():
    try:
        return int(pltpu.get_tpu_info().vmem_capacity_bytes)
    except Exception:
        return 64 * 1024 * 1024  # conservative (v7x-sized) fallback


def _vmem_limit_bytes(estimate, capacity):
    """Scoped-VMEM limit: only raise above the default when needed, and never
    above ~72% of physical VMEM (leaves headroom for internal scratch)."""
    if estimate <= 12 * 1024 * 1024:
        return None  # default scoped limit (16 MiB v5e / 32 MiB v6e,v7x) is fine
    cap = int(capacity * 0.72)
    return int(min(max(int(estimate * 1.25), 32 * 1024 * 1024), cap))


# ----------------------------------------------------------------------------
# Kernel bodies
# ----------------------------------------------------------------------------
def _onehot_matmul(ids, tbl_ref, kc):
    """Exact gather as a K-chunked one-hot MXU matmul.

    ids:     (1, tb) int32 token ids (lane-dense row).
    tbl_ref: (V, D) masked-table Ref (VMEM input or scratch).
    Returns  (tb, D) float32.
    """
    tb = ids.shape[1]
    V, D = tbl_ref.shape
    acc = jnp.zeros((tb, D), jnp.float32)
    off = 0
    while off < V:                       # static Python loop -> unrolled
        c = min(kc, V - off)
        # one-hot^T chunk: (c, tb); broadcast (1, tb) ids over sublanes (free).
        iota = lax.broadcasted_iota(jnp.int32, (c, tb), 0) + off
        oh = (iota == ids).astype(tbl_ref.dtype)       # exact 0/1
        acc = acc + lax.dot_general(
            oh, tbl_ref[pl.ds(off, c), :],
            dimension_numbers=(((0,), (0,)), ((), ())),  # contract over V chunk
            preferred_element_type=jnp.float32)
        off += c
    return acc


def _fused_gather_kernel(idx_ref, w_ref, m_ref, o_ref, tbl_ref, *, kc):
    # idx_ref: (1, 1, tb) int32 token ids for this block (lane-dense VMEM)
    # w_ref/m_ref: (V, D) weight / prune mask, resident (constant index map)
    # tbl_ref: (V, D) VMEM scratch holding the masked table
    # o_ref:   (tb, D) output block
    @pl.when(pl.program_id(0) == 0)
    def _():
        tbl_ref[...] = w_ref[...] * m_ref[...]   # fuse mask once, in-kernel

    ids = idx_ref[0]                              # (1, tb)
    o_ref[...] = _onehot_matmul(ids, tbl_ref, kc).astype(o_ref.dtype)


def _resident_gather_kernel(idx_ref, tbl_ref, o_ref, *, kc):
    # idx_ref: (1, 1, tb) int32; tbl_ref: (V, D) pre-masked table (resident);
    # o_ref: (tb, D)
    ids = idx_ref[0]                              # (1, tb)
    o_ref[...] = _onehot_matmul(ids, tbl_ref, kc).astype(o_ref.dtype)


def _fuse_mask_kernel(w_ref, m_ref, o_ref):
    # o = w * m on an (rb, cb) tile (VPU elementwise).
    o_ref[...] = w_ref[...] * m_ref[...]


# ----------------------------------------------------------------------------
# pallas_call wrappers
# ----------------------------------------------------------------------------
def _fuse_mask(weight, mask):
    """masked = weight * mask, tiled over rows AND columns (~1 MiB per tile per
    array, so 3 arrays x 2 buffers stays under the default scoped-VMEM limit)."""
    V, D = weight.shape
    itemsize = weight.dtype.itemsize
    cb = D if D <= 4096 else 4096                       # multiple of 128 or == D
    rb = _round_up(max((1 << 20) // max(cb * itemsize, 1), 8), 8)
    if rb >= V:
        rb = V                                          # full dim always legal
    return pl.pallas_call(
        _fuse_mask_kernel,
        out_shape=jax.ShapeDtypeStruct((V, D), weight.dtype),
        grid_spec=pltpu.PrefetchScalarGridSpec(
            num_scalar_prefetch=0,
            grid=(pl.cdiv(V, rb), pl.cdiv(D, cb)),
            in_specs=[
                pl.BlockSpec((rb, cb), lambda i, j: (i, j)),
                pl.BlockSpec((rb, cb), lambda i, j: (i, j)),
            ],
            out_specs=pl.BlockSpec((rb, cb), lambda i, j: (i, j)),
        ),
        compiler_params=pltpu.CompilerParams(
            dimension_semantics=("parallel", "parallel"),
        ),
    )(weight, mask)


def _gather_fused(idx3d, weight, mask, *, tb, kc, vmem_limit):
    """Single-kernel path: mask folded in-kernel, table built into VMEM scratch."""
    n_blocks = idx3d.shape[0]
    V, D = weight.shape
    return pl.pallas_call(
        functools.partial(_fused_gather_kernel, kc=kc),
        out_shape=jax.ShapeDtypeStruct((n_blocks * tb, D), weight.dtype),
        grid_spec=pltpu.PrefetchScalarGridSpec(
            num_scalar_prefetch=0,
            grid=(n_blocks,),
            in_specs=[
                pl.BlockSpec((1, 1, tb), lambda i: (i, 0, 0)),   # token ids
                pl.BlockSpec((V, D), lambda i: (0, 0)),          # weight (resident)
                pl.BlockSpec((V, D), lambda i: (0, 0)),          # mask   (resident)
            ],
            out_specs=pl.BlockSpec((tb, D), lambda i: (i, 0)),
            scratch_shapes=[pltpu.VMEM((V, D), weight.dtype)],   # masked table
        ),
        # "arbitrary": the masked-table scratch is built once at i == 0 and
        # reused, so the token-block axis must run sequentially on one core.
        compiler_params=pltpu.CompilerParams(
            dimension_semantics=("arbitrary",),
            vmem_limit_bytes=vmem_limit,
        ),
    )(idx3d, weight, mask)


def _gather_resident(idx3d, table, *, tb, kc, vmem_limit):
    """Two-pass path: pre-masked table kept VMEM-resident, one-hot MXU gather."""
    n_blocks = idx3d.shape[0]
    V, D = table.shape
    return pl.pallas_call(
        functools.partial(_resident_gather_kernel, kc=kc),
        out_shape=jax.ShapeDtypeStruct((n_blocks * tb, D), table.dtype),
        grid_spec=pltpu.PrefetchScalarGridSpec(
            num_scalar_prefetch=0,
            grid=(n_blocks,),
            in_specs=[
                pl.BlockSpec((1, 1, tb), lambda i: (i, 0, 0)),   # token ids
                pl.BlockSpec((V, D), lambda i: (0, 0)),          # masked table
            ],
            out_specs=pl.BlockSpec((tb, D), lambda i: (i, 0)),
        ),
        compiler_params=pltpu.CompilerParams(
            dimension_semantics=("parallel",),
            vmem_limit_bytes=vmem_limit,
        ),
    )(idx3d, table)


# ----------------------------------------------------------------------------
# Public wrapper
# ----------------------------------------------------------------------------
def masked_embedding(indices, weight, mask, *, block_tokens=None,
                     _force_path=None):
    """Forward of MaskedEmbedding: (weight * mask)[indices].

    indices: int array of arbitrary shape; weight/mask: (V, D).
    Returns (*indices.shape, D) with weight's dtype.
    """
    V, D = weight.shape
    assert mask.shape == (V, D)
    in_shape = indices.shape
    mask = mask.astype(weight.dtype)
    itemsize = weight.dtype.itemsize

    flat_idx = indices.reshape(-1)
    N = flat_idx.shape[0]
    if N == 0:
        return jnp.zeros((*in_shape, D), dtype=weight.dtype)

    # Clamp defensively (PyTorch F.embedding would raise on OOB; we never read
    # off-table).  NOTE: out-of-range ids are silently remapped, not errored.
    flat_idx = jnp.clip(flat_idx.astype(jnp.int32), 0, V - 1)

    # ---- adaptive token block: ~1 MiB output block, clamped ----------------
    if block_tokens is None:
        tb = min(max(_round_up((1 << 20) // max(D * itemsize, 1), 8), 128), 4096)
    else:
        tb = _round_up(max(int(block_tokens), 8), 8)
    tb = max(8, min(tb, _round_up(N, 8)))
    n_pad = _round_up(N, tb)
    n_blocks = n_pad // tb

    # K-chunk for the one-hot matmul: MXU-native depth, bounds the temp to
    # tb*kc instead of tb*V.
    kc = V if V <= 256 else 256

    # ---- generation-aware VMEM accounting (counts 2x input buffering) ------
    capacity = _tpu_vmem_capacity_bytes()
    safe = int(capacity * 0.72)
    table_bytes = V * D * itemsize
    blk_bytes = (2 * tb * D * itemsize        # double-buffered output blocks
                 + 2 * tb * 4                 # double-buffered idx blocks
                 + tb * D * 4                 # f32 accumulator temp
                 + kc * tb * 4                # one-hot / iota temps
                 + (2 << 20))                 # headroom for internal scratch
    fused_need = 5 * table_bytes + blk_bytes      # 2x w + 2x m + masked scratch
    resident_need = 2 * table_bytes + blk_bytes   # 2x masked table

    path = _force_path
    if path is None:
        if fused_need <= safe:
            path = "fused"
        elif resident_need <= safe:
            path = "resident"
        else:
            path = "xla"

    # ---- pad + reshape indices to lane-dense (n_blocks, 1, tb) blocks ------
    if n_pad != N:
        flat_idx = jnp.pad(flat_idx, (0, n_pad - N))   # pad with valid row 0
    idx3d = flat_idx.reshape(n_blocks, 1, tb)

    if path == "fused":
        out = _gather_fused(idx3d, weight, mask, tb=tb, kc=kc,
                            vmem_limit=_vmem_limit_bytes(fused_need, capacity))
    elif path == "resident":
        masked_w = _fuse_mask(weight, mask)
        out = _gather_resident(idx3d, masked_w, tb=tb, kc=kc,
                               vmem_limit=_vmem_limit_bytes(resident_need,
                                                            capacity))
    else:
        # TODO(synk): streamed manual-DMA gather (pl.ANY table + double-buffered
        # make_async_copy) for tables too large to keep VMEM-resident.
        masked_w = _fuse_mask(weight, mask)
        out = jnp.take(masked_w, flat_idx, axis=0)

    return out[:N].reshape(*in_shape, D)


# ----------------------------------------------------------------------------
# Demo / self-test
# ----------------------------------------------------------------------------
if __name__ == "__main__":
    # Module config (synthetic, deterministic init).
    num_embeddings = 16   # vocabulary size V
    embedding_dim = 128   # embedding size D (lane-dense)
    padding_idx = 0
    batch, seq = 2, 8

    key = jax.random.PRNGKey(0)
    k_w, k_i = jax.random.split(key)

    # weight ~ N(0, 1), padding_idx row zeroed (as in reset_parameters).
    weight = jax.random.normal(
        k_w, (num_embeddings, embedding_dim), dtype=jnp.float32)
    weight = weight.at[padding_idx].set(0.0)

    # mask: ones by default; zero some entries to emulate a pruned table.
    mask = jnp.ones((num_embeddings, embedding_dim), dtype=jnp.float32)
    mask = mask.at[:, ::4].set(0.0)

    # TODO(synk): max_norm renormalization (in-place weight rescale) not
    # implemented; default max_norm=None path only. padding_idx zero-gradient /
    # scale_grad_by_freq / sparse are backward-pass semantics (forward-only).

    indices = jax.random.randint(
        k_i, (batch, seq), 0, num_embeddings, dtype=jnp.int32)
    indices = indices.at[0, 0].set(padding_idx)  # exercise the zeroed row

    # Pure-JAX reference: gather of (weight * mask).
    ref = (weight * mask)[indices]

    # Primary (auto-selected, fused mask-in-kernel) path.
    out = jax.block_until_ready(masked_embedding(indices, weight, mask))
    assert out.shape == (batch, seq, embedding_dim)
    assert jnp.allclose(out, ref, atol=1e-6, rtol=1e-6)

    # Also exercise the two-pass path (tiled fuse-mask pre-pass + resident
    # one-hot MXU gather) used for mid-size tables.
    out_res = jax.block_until_ready(
        masked_embedding(indices, weight, mask, _force_path="resident"))
    assert jnp.allclose(out_res, ref, atol=1e-6, rtol=1e-6)

    print("KERNEL_OK")
</pallas_src>

<mosaic_0001>
module attributes {stable_mosaic.version = 11 : i64} {
  func.func @_fused_gather_kernel(%arg0: i32, %arg1: memref<1x1x16xi32, #tpu.memory_space<vmem>>, %arg2: memref<16x128xf32, #tpu.memory_space<vmem>>, %arg3: memref<16x128xf32, #tpu.memory_space<vmem>>, %arg4: memref<16x128xf32, #tpu.memory_space<vmem>>, %arg5: memref<16x128xf32, #tpu.memory_space<vmem>>) attributes {dimension_semantics = [#tpu.dimension_semantics<arbitrary>], iteration_bounds = array<i64: 1>, scalar_prefetch = 0 : i64, scratch_operands = 1 : i64, tpu.core_type = #tpu.core_type<tc>, window_params = [{transform_indices = @transform_0, window_bounds = array<i64: 1, 1, 16>}, {pipeline_mode = #tpu.pipeline_mode<synchronous>, transform_indices = @transform_1, window_bounds = array<i64: 16, 128>}, {pipeline_mode = #tpu.pipeline_mode<synchronous>, transform_indices = @transform_2, window_bounds = array<i64: 16, 128>}, {transform_indices = @transform_3, window_bounds = array<i64: 16, 128>}]} {
    %c0_i32 = arith.constant 0 : i32
    %0 = arith.cmpi eq, %arg0, %c0_i32 : i32
    %1 = arith.extui %0 : i1 to i32
    %c0_i32_0 = arith.constant 0 : i32
    %2 = arith.cmpi ne, %1, %c0_i32_0 : i32
    scf.if %2 {
      %c0_9 = arith.constant 0 : index
      %c0_10 = arith.constant 0 : index
      %17 = vector.load %arg2[%c0_9, %c0_10] : memref<16x128xf32, #tpu.memory_space<vmem>>, vector<16x128xf32>
      %c0_11 = arith.constant 0 : index
      %c0_12 = arith.constant 0 : index
      %18 = vector.load %arg3[%c0_11, %c0_12] : memref<16x128xf32, #tpu.memory_space<vmem>>, vector<16x128xf32>
      %19 = arith.mulf %17, %18 : vector<16x128xf32>
      %c0_13 = arith.constant 0 : index
      %c0_14 = arith.constant 0 : index
      %20 = vector.load %arg5[%c0_13, %c0_14] : memref<16x128xf32, #tpu.memory_space<vmem>>, vector<16x128xf32>
      tpu.vector_store %arg5[%c0_13, %c0_14], %19 {strides = array<i32>} : memref<16x128xf32, #tpu.memory_space<vmem>>, vector<16x128xf32>,
    } else {
    }
    %c0 = arith.constant 0 : index
    %c0_1 = arith.constant 0 : index
    %c0_2 = arith.constant 0 : index
    %3 = vector.load %arg1[%c0, %c0_1, %c0_2] : memref<1x1x16xi32, #tpu.memory_space<vmem>>, vector<1x1x16xi32>
    %4 = vector.shape_cast %3 : vector<1x1x16xi32> to vector<1x16xi32>
    %cst = arith.constant 0.000000e+00 : f32
    %5 = vector.broadcast %cst : f32 to vector<16x128xf32>
    %6 = tpu.iota {dimensions = array<i32: 0>} : vector<16x16xi32>
    %c0_i32_3 = arith.constant 0 : i32
    %7 = vector.broadcast %c0_i32_3 : i32 to vector<16x16xi32>
    %8 = arith.addi %6, %7 : vector<16x16xi32>
    %9 = vector.broadcast %4 : vector<1x16xi32> to vector<16x16xi32>
    %10 = arith.cmpi eq, %8, %9 : vector<16x16xi32>
    %11 = arith.extui %10 : vector<16x16xi1> to vector<16x16xi32>
    %12 = arith.sitofp %11 : vector<16x16xi32> to vector<16x16xf32>
    %c0_4 = arith.constant 0 : index
    %c0_5 = arith.constant 0 : index
    %13 = vector.load %arg5[%c0_4, %c0_5] : memref<16x128xf32, #tpu.memory_space<vmem>>, vector<16x128xf32>
    %cst_6 = arith.constant dense<0.000000e+00> : vector<16x128xf32>
    %14 = tpu.matmul %12, %13, %cst_6 {dimension_numbers = #tpu.dot_dimension_numbers<[0], [0], [1], [1], [0, 1, 1, 1], [], []>} : vector<16x16xf32>, vector<16x128xf32>, vector<16x128xf32> -> vector<16x128xf32>
    %15 = arith.addf %5, %14 : vector<16x128xf32>
    %c0_7 = arith.constant 0 : index
    %c0_8 = arith.constant 0 : index
    %16 = vector.load %arg4[%c0_7, %c0_8] : memref<16x128xf32, #tpu.memory_space<vmem>>, vector<16x128xf32>
    tpu.vector_store %arg4[%c0_7, %c0_8], %15 {strides = array<i32>} : memref<16x128xf32, #tpu.memory_space<vmem>>, vector<16x128xf32>,
    return
  }
  func.func @transform_0(%arg0: i32) -> (i32, i32, i32) {
    %c0_i32 = arith.constant 0 : i32
    %c0_i32_0 = arith.constant 0 : i32
    %c0_i32_1 = arith.constant 0 : i32
    return %arg0, %c0_i32, %c0_i32_0 : i32, i32, i32
  }
  func.func @transform_1(%arg0: i32) -> (i32, i32) {
    %c0_i32 = arith.constant 0 : i32
    %c0_i32_0 = arith.constant 0 : i32
    %c0_i32_1 = arith.constant 0 : i32
    return %c0_i32, %c0_i32_0 : i32, i32
  }
  func.func @transform_2(%arg0: i32) -> (i32, i32) {
    %c0_i32 = arith.constant 0 : i32
    %c0_i32_0 = arith.constant 0 : i32
    %c0_i32_1 = arith.constant 0 : i32
    return %c0_i32, %c0_i32_0 : i32, i32
  }
  func.func @transform_3(%arg0: i32) -> (i32, i32) {
    %c0_i32 = arith.constant 0 : i32
    %c0_i32_0 = arith.constant 0 : i32
    return %arg0, %c0_i32 : i32, i32
  }
}

</mosaic_0001>

<bundles_post_ra>
// kernel: tpu_custom_call.1
= control target key start
LH: loop header
LB: loop body
LE: loop exit
PB: predicated region body
PF: predicated region fallthrough
CT: control target
= control target key end

     0   :  { %8 = vsyncpa [#allocation4], 0  ;;  %s373_s0 = inlined_call_operand.hbm [shape: s32[1,1,16], index: 0, kind: input, shape index: {}]   ;;  %s374_s1 = inlined_call_operand.hbm [shape: f32[16,128], index: 1, kind: input, shape index: {}]   ;;  %s375_s2 = inlined_call_operand.hbm [shape: f32[16,128], index: 2, kind: input, shape index: {}]   ;;  %s376_s3 = inlined_call_operand.hbm [shape: f32[16,128], index: 3, kind: output, shape index: {}]  }
   0x1   :  { %9 = vsyncpa [#allocation7], 0 }
   0x2   :  { %10 = vsyncpa [#allocation5], 0  ;;  %s325_s12 = smov [#allocation6]  }
   0x3   :  { %s26_s13 = sshll.u32 %s325_s12, 4  ;;  %s27_s13 = int_to_ptr.vmem [resolvable:$true] %s26_s13 }
   0x4   :  { %s247_s14 = scalar_lea.vmem %s27_s13, 256  ;;  %p252_p1 = scmp.lt.s32.totalorder %s27_s13, %s27_s13 }
   0x5   :  { %p248_p0 = scmp.ne.s32.totalorder %s27_s13, %s247_s14  ;;  %p253_p2 = scmp.lt.s32.totalorder %s247_s14, %s247_s14 }
   0x7   :  { %p254_p3 = por %p253_p2, %p252_p1 }
   0x9   :  { %p255_p4 = pnand %p254_p3, %p248_p0 }
   0xb   :  { %258 = shalt.err (!%p255_p4)
}
   0xc   :  { %s326_s15 = smov 128   ;;  %s327_s16 = smov 8  }
   0xd   :  { %32 = dma.hbm_to_vmem [thread:$0]  %s374_s1, 256, %s27_s13, [#allocation7], %s326_s15, %s326_s15, %s327_s16  }
   0xe   :  { %s328_s19 = smov [#allocation3]   ;;  %s329_s21 = smov [#allocation8]  }
   0xf   :  { %s17_s20 = sshll.u32 %s328_s19, 4  ;;  %s38_s22 = sshll.u32 %s329_s21, 4  ;;  %s18_s20 = int_to_ptr.vmem [resolvable:$true] %s17_s20  ;;  %s39_s22 = int_to_ptr.vmem [resolvable:$true] %s38_s22 }
  0x10   :  { %s267_s23 = scalar_lea.vmem %s18_s20, 16  ;;  %s271_s24 = scalar_lea.vmem %s18_s20, 32 }
  0x11   :  { %p268_p5 = scmp.ne.s32.totalorder %s18_s20, %s267_s23  ;;  %p272_p6 = scmp.lt.s32.totalorder %s18_s20, %s18_s20 }
  0x12   :  { %p273_p7 = scmp.lt.s32.totalorder %s271_s24, %s267_s23 }
  0x14   :  { %p274_p8 = por %p273_p7, %p272_p6 }
  0x16   :  { %p275_p9 = pnand %p274_p8, %p268_p5 }
  0x18   :  { %278 = shalt.err (!%p275_p9)
}
  0x19   :  { %20 = dma.hbm_to_vmem [thread:$0]  %s373_s0, 16, %s18_s20, [#allocation4]  }
  0x1a   :  { %s287_s27 = scalar_lea.vmem %s39_s22, 256  ;;  %p292_p11 = scmp.lt.s32.totalorder %s39_s22, %s39_s22 }
  0x1b   :  { %p288_p10 = scmp.ne.s32.totalorder %s39_s22, %s287_s27  ;;  %p293_p12 = scmp.lt.s32.totalorder %s287_s27, %s287_s27 }
  0x1d   :  { %p294_p13 = por %p293_p12, %p292_p11 }
  0x1f   :  { %p295_p0 = pnand %p294_p13, %p288_p10 }
  0x21   :  { %298 = shalt.err (!%p295_p0)
}
  0x22   :  { %44 = dma.hbm_to_vmem [thread:$0]  %s375_s2, 256, %s39_s22, [#allocation7], %s326_s15, %s326_s15, %s327_s16  }
  0x23   :  { %319 = dma.done.wait [#allocation4], 16  }
  0x24   :  { %320 = vsyncadd [#allocation4], 4294967280 }
  0x25   :  { %321 = dma.done.wait [#allocation7], 512  }
  0x26   :  { %322 = vsyncadd [#allocation7], 4294966784  ;;  %v67_v0 = vlaneseq  ;;  %v216_v3 = vld [vmem:[#allocation3] ss:$0 sm:$0xff]  ;;  %v59_v4 = vld [vmem:[#allocation6 + $0x8] sm:$0xff]  ;;  %v330_v9 = vmov 0.0  }
  0x27   :  { %v61_v5 = vld [vmem:[#allocation8 + $0x8] sm:$0xff]  ;;  %v58_v7 = vld [vmem:[#allocation6] sm:$0xff]  ;;  %v60_v8 = vld [vmem:[#allocation8] sm:$0xff]  ;;  %vm114_vm2 = vcmask 130048   ;;  %s331_s0 = smov [#allocation9]  }
  0x28   :  { %v68_v1 = vshrl.u32 %v67_v0, 7  ;;  %v63_v6 = vmul.f32 %v61_v5, %v59_v4  ;;  %v62_v11 = vmul.f32 %v60_v8, %v58_v7  ;;  %s203_s2 = sshll.u32 %s331_s0, 4  ;;  %s204_s2 = int_to_ptr.vmem [resolvable:$true] %s203_s2 }
  0x29   :  { %s299_s29 = scalar_lea.vmem %s204_s2, 256  ;;  %p304_p2 = scmp.lt.s32.totalorder %s204_s2, %s204_s2 }
  0x2a   :  { %v69_v2 = vadd.s32 8, %v68_v1  ;;  %vm74_vm0 = vcmp.eq.s32.totalorder %v68_v1, %v216_v3  ;;  %225 = vmatprep.subr.mxu0 %v63_v6  ;;  %p300_p1 = scmp.ne.s32.totalorder %s204_s2, %s299_s29  ;;  %p305_p3 = scmp.lt.s32.totalorder %s299_s29, %s299_s29 }
  0x2b   :  { %v217_v10 = vsel %vm74_vm0, 1.0, %v330_v9  ;;  %226 = vmatpush3.msra.mxu0 %v63_v6 }
  0x2c   :  { %vm75_vm1 = vcmp.eq.s32.totalorder %v69_v2, %v216_v3  ;;  %82 = vxpose.xlu0.b32.start [1/2] (short) (narrow) %v217_v10, 16  ;;  %227 = vmatprep.subr.mxu0 %v62_v11  ;;  %p306_p4 = por %p305_p3, %p304_p2 }
  0x2d   :  { %v218_v12 = vsel %vm75_vm1, 1.0, %v330_v9  ;;  %228 = vmatpush3.msra.mxu0 %v62_v11 }
  0x2e   :  { %p307_p5 = pnand %p306_p4, %p300_p1 }
  0x30   :  { %83 = vxpose.xlu0.b32.end [2/2] (short) (narrow) %v218_v12, 16 }
  0xa8   :  { %v98_v13 = vpop.trf.xlu0 }
  0xa9   :  { %229 = vmatprep.mubr.msk.f32.mxu0 %vm114_vm2, %v98_v13 }
  0xac   :  { %v99_v14 = vpop.trf.xlu0 }
  0xad   :  { %230 = vmatmul.mubr.msk.f32.vlgmr.msra.gmra.mxu0 %vm114_vm2, %v99_v14 }
 0x16d   :  { %v231_v15 = vpop.f32.mrf.mxu0 }
 0x16e   :  { %197 = vst [vmem:[#allocation9 + $0x8] sm:$0xff] %v231_v15 }
 0x16f   :  { %v187_v16 = vpop.f32.mrf.mxu0 }
 0x170   :  { %196 = vst [vmem:[#allocation9] sm:$0xff] %v187_v16 }
 0x171   :  { %310 = shalt.err (!%p307_p5)
}
 0x172   :  { %209 = dma.vmem_to_hbm [thread:$0]  %s204_s2, 256, %s376_s3, [#allocation5], %s326_s15, %s326_s15, %s327_s16  }
 0x173   :  { %323 = dma.done.wait [#allocation5], 256  }
 0x174   :  { %324 = vsyncadd [#allocation5], 4294967040 }
 0x175   :  { %213 = vsyncpa [#allocation4], 1 }
 0x176   :  { %214 = vsyncpa [#allocation7], 1 }
 0x177   :  { %215 = vsyncpa [#allocation5], 1 }

</bundles_post_ra>
